<compile_context>
chip_gen: v5e
topology: v5e:2x2
jax: 0.10.0
libtpu: 0.0.40
codegen_flags: <defaults>
</compile_context>

<pallas_src>
import functools

import jax
import jax.numpy as jnp
import numpy as np
from jax.experimental import pallas as pl
from jax.experimental.pallas import tpu as pltpu


def _round_up(x, m):
    return (x + m - 1) // m * m


def _conv_bn_lrelu_kernel(x_ref, w_ref, shift_ref, o_ref, slab_ref,
                          *, K, Wp, L_out, Cin_pad):
    # x_ref:     (1, Cin_pad, L_in)        bf16  flattened zero-padded image (lanes = spatial)
    # w_ref:     (Cout_pad, K*K*Cin_pad)   bf16  BN-scale-folded conv weights
    # shift_ref: (Cout_pad, 1)             f32   folded BN shift (beta - mean * scale)
    # o_ref:     (1, Cout_pad, L_out)      bf16  flattened output (padded-width coords)
    # slab_ref:  (K*K*Cin_pad, L_out)      bf16  VMEM scratch: im2col slab
    x = x_ref[0]                                           # (Cin_pad, L_in), loaded once

    # im2col: each tap (kh, kw) is a pure lane-offset window of the flattened image.
    # Per-tap stores land on 16-row (bf16 packed) boundaries -> no repacking copies.
    for kh in range(K):                                    # static, unrolled taps
        for kw in range(K):
            tap = kh * K + kw
            off = kh * Wp + kw
            slab_ref[tap * Cin_pad:(tap + 1) * Cin_pad, :] = x[:, off:off + L_out]

    # single MXU contraction, f32 accumulation
    acc = jnp.dot(w_ref[...], slab_ref[...],
                  preferred_element_type=jnp.float32)      # (Cout_pad, L_out) f32

    # BatchNorm2d (eval) shift + leaky_relu(0.2) in f32; cast to bf16 only at the store
    y = acc + shift_ref[...]
    y = jnp.where(y > 0, y, 0.2 * y)
    # dropout(p=0.2) in eval mode == identity
    o_ref[0] = y.astype(o_ref.dtype)


def conv_layer_forward(x, weight, gamma, beta, running_mean, running_var,
                       *, stride=1, padding=1, dilation=1, eps=1e-5):
    """ConvLayer.forward: conv2d(bias=False) -> BatchNorm2d(eval) -> leaky_relu(0.2) -> dropout(eval)."""
    # TODO(synk): training-mode dropout (RNG mask), batch-statistics BatchNorm and the
    #             sample_norm branch are not implemented; eval-mode BN semantics only.
    assert stride == 1 and dilation == 1, "kernel implements stride=1, dilation=1"
    B, Cin, H, W = x.shape
    Cout, Cin2, K, K2 = weight.shape
    assert Cin == Cin2 and K == K2

    Hp, Wp = H + 2 * padding, W + 2 * padding
    Ho, Wo = Hp - (K - 1), Wp - (K - 1)

    SUB = 16                                   # bf16 sublane-packing granularity
    Cin_pad = _round_up(Cin, SUB)
    Cout_pad = _round_up(Cout, SUB)
    KKC = K * K * Cin_pad                      # contraction depth (>= 128 here)

    L_valid = Ho * Wp                          # flattened output length (padded-width coords)
    L_out = _round_up(L_valid, 128)            # lane-dense output block
    max_off = (K - 1) * Wp + (K - 1)           # largest tap offset
    L_need = L_out + max_off                   # input window must cover every tap offset

    # extra zero rows at the bottom so a SINGLE spatial pad already covers L_need
    extra_rows = max(0, -(-(L_need - Hp * Wp) // Wp))
    Hp_ext = Hp + extra_rows
    L_in = Hp_ext * Wp                         # no 128 rounding needed (full-dim block)

    # --- wrapper glue: one bf16 pad pass (channels + spatial + extra rows), then reshape ---
    # TODO(synk): for stacked ConvLayers keep activations in this flattened bf16 layout and
    #             fold the zero-pad into the producer layer instead of a separate HBM pass.
    xb = x.astype(jnp.bfloat16)
    xp = jnp.pad(xb, ((0, 0),
                      (0, Cin_pad - Cin),
                      (padding, padding + extra_rows),
                      (padding, padding)))
    xf = xp.reshape(B, Cin_pad, L_in)

    # fold BN scale into the weights; only the per-channel shift survives
    inv = 1.0 / jnp.sqrt(running_var.astype(jnp.float32) + eps)
    scale = gamma.astype(jnp.float32) * inv                               # (Cout,)
    shift = (beta.astype(jnp.float32)
             - running_mean.astype(jnp.float32) * scale)                  # (Cout,)
    shift = jnp.pad(shift, (0, Cout_pad - Cout)).reshape(Cout_pad, 1)

    w_scaled = weight.astype(jnp.float32) * scale[:, None, None, None]    # (Cout,Cin,K,K)
    w_t = jnp.transpose(w_scaled, (0, 2, 3, 1))                           # (Cout,K,K,Cin)
    w_t = jnp.pad(w_t, ((0, Cout_pad - Cout), (0, 0), (0, 0), (0, Cin_pad - Cin)))
    w2 = w_t.reshape(Cout_pad, KKC).astype(jnp.bfloat16)                  # bf16 MXU operand

    kernel = functools.partial(_conv_bn_lrelu_kernel,
                               K=K, Wp=Wp, L_out=L_out, Cin_pad=Cin_pad)

    flops = 2 * B * Ho * Wo * K * K * Cin * Cout
    bytes_accessed = (int(xf.size) * 2 + int(w2.size) * 2 + Cout_pad * 4
                      + B * Cout_pad * L_out * 2)

    # explicit VMEM budget: double-buffered blocks + slab scratch + f32 intermediates
    vmem_bytes = (2 * Cin_pad * L_in * 2          # input block (bf16), double-buffered
                  + 2 * Cout_pad * KKC * 2        # weights (bf16), double-buffered
                  + 2 * Cout_pad * 1 * 4          # shift (f32)
                  + 2 * Cout_pad * L_out * 2      # output block (bf16), double-buffered
                  + KKC * L_out * 2               # im2col slab scratch (bf16)
                  + Cout_pad * L_out * 4)         # f32 accumulator
    vmem_limit = int(min(max(2 * vmem_bytes + (1 << 20), 4 << 20), 64 << 20))

    # TODO(synk): for large images, add a row-block grid (grid=(B, cdiv(Ho, TH))) with a
    #             halo'd input window so slab + acc + 2x-buffered blocks stay under the
    #             v7x 64 MiB VMEM budget, and mark it "parallel" so both v7x TensorCores
    #             get work even at B=1; at these small shapes one image per step fits.
    out_flat = pl.pallas_call(
        kernel,
        out_shape=jax.ShapeDtypeStruct((B, Cout_pad, L_out), jnp.bfloat16),
        grid=(B,),
        in_specs=[
            pl.BlockSpec((1, Cin_pad, L_in), lambda b: (b, 0, 0)),
            pl.BlockSpec((Cout_pad, KKC), lambda b: (0, 0)),
            pl.BlockSpec((Cout_pad, 1), lambda b: (0, 0)),
        ],
        out_specs=pl.BlockSpec((1, Cout_pad, L_out), lambda b: (b, 0, 0)),
        scratch_shapes=[pltpu.VMEM((KKC, L_out), jnp.bfloat16)],
        compiler_params=pltpu.CompilerParams(
            dimension_semantics=("parallel",),
            vmem_limit_bytes=vmem_limit),
        cost_estimate=pl.CostEstimate(flops=flops, transcendentals=0,
                                      bytes_accessed=bytes_accessed),
    )(xf, w2, shift)

    # TODO(synk): stacked ConvLayers should consume the flattened padded bf16 layout
    #             directly; this trim is only for the standalone NCHW interface.
    out = out_flat[:, :Cout, :L_valid].reshape(B, Cout, Ho, Wp)[:, :, :, :Wo]
    return out                                   # bf16, NCHW


if __name__ == "__main__":
    key = jax.random.PRNGKey(0)
    kx, kw, kg, kb = jax.random.split(key, 4)

    B, Cin, H, W = 2, 4, 16, 16
    Cout, K = 8, 3

    x = jax.random.normal(kx, (B, Cin, H, W), jnp.float32)
    weight = 0.1 * jax.random.normal(kw, (Cout, Cin, K, K), jnp.float32)   # Conv2d OIHW, bias=False
    gamma = 1.0 + 0.1 * jax.random.normal(kg, (Cout,), jnp.float32)        # BN weight
    beta = 0.1 * jax.random.normal(kb, (Cout,), jnp.float32)               # BN bias
    running_mean = jnp.zeros((Cout,), jnp.float32)                         # BN defaults
    running_var = jnp.ones((Cout,), jnp.float32)

    out = conv_layer_forward(x, weight, gamma, beta, running_mean, running_var,
                             stride=1, padding=1)
    out = jax.block_until_ready(out)
    out_f32 = np.asarray(out.astype(jnp.float32))

    # pure-JAX f32 reference with the same eval-mode semantics (sanity check)
    ref = jax.lax.conv_general_dilated(
        x, weight, window_strides=(1, 1), padding=((1, 1), (1, 1)),
        dimension_numbers=("NCHW", "OIHW", "NCHW"))
    inv = 1.0 / jnp.sqrt(running_var + 1e-5)
    ref = ref * (gamma * inv)[None, :, None, None] \
        + (beta - running_mean * gamma * inv)[None, :, None, None]
    ref = jnp.where(ref > 0, ref, 0.2 * ref)
    ref = np.asarray(ref)

    assert out.shape == (B, Cout, H, W), out.shape
    assert np.all(np.isfinite(out_f32))
    assert np.allclose(out_f32, ref, rtol=3e-2, atol=3e-2)
    print("KERNEL_OK")
</pallas_src>

<mosaic_0001>
module attributes {stable_mosaic.version = 11 : i64} {
  func.func @_conv_bn_lrelu_kernel(%arg0: i32, %arg1: memref<1x16x432xbf16, #tpu.memory_space<vmem>>, %arg2: memref<16x144xbf16, #tpu.memory_space<vmem>>, %arg3: memref<16x1xf32, #tpu.memory_space<vmem>>, %arg4: memref<1x16x384xbf16, #tpu.memory_space<vmem>>, %arg5: memref<144x384xbf16, #tpu.memory_space<vmem>>) attributes {dimension_semantics = [#tpu.dimension_semantics<parallel>], iteration_bounds = array<i64: 2>, scalar_prefetch = 0 : i64, scratch_operands = 1 : i64, tpu.core_type = #tpu.core_type<tc>, window_params = [{transform_indices = @transform_0, window_bounds = array<i64: 1, 16, 432>}, {pipeline_mode = #tpu.pipeline_mode<synchronous>, transform_indices = @transform_1, window_bounds = array<i64: 16, 144>}, {pipeline_mode = #tpu.pipeline_mode<synchronous>, transform_indices = @transform_2, window_bounds = array<i64: 16, 1>}, {transform_indices = @transform_3, window_bounds = array<i64: 1, 16, 384>}]} {
    %c0 = arith.constant 0 : index
    %c0_0 = arith.constant 0 : index
    %c0_1 = arith.constant 0 : index
    %0 = vector.load %arg1[%c0, %c0_0, %c0_1] : memref<1x16x432xbf16, #tpu.memory_space<vmem>>, vector<1x16x432xbf16>
    %1 = vector.shape_cast %0 : vector<1x16x432xbf16> to vector<16x432xbf16>
    %2 = vector.extract_strided_slice %1 {offsets = [0, 0], sizes = [16, 384], strides = [1, 1]} : vector<16x432xbf16> to vector<16x384xbf16>
    %c0_2 = arith.constant 0 : index
    %c0_3 = arith.constant 0 : index
    %3 = vector.load %arg5[%c0_2, %c0_3] : memref<144x384xbf16, #tpu.memory_space<vmem>>, vector<16x384xbf16>
    tpu.vector_store %arg5[%c0_2, %c0_3], %2 {strides = array<i32>} : memref<144x384xbf16, #tpu.memory_space<vmem>>, vector<16x384xbf16>,
    %4 = vector.extract_strided_slice %1 {offsets = [0, 1], sizes = [16, 384], strides = [1, 1]} : vector<16x432xbf16> to vector<16x384xbf16>
    %c16 = arith.constant 16 : index
    %c0_4 = arith.constant 0 : index
    %5 = vector.load %arg5[%c16, %c0_4] : memref<144x384xbf16, #tpu.memory_space<vmem>>, vector<16x384xbf16>
    tpu.vector_store %arg5[%c16, %c0_4], %4 {strides = array<i32>} : memref<144x384xbf16, #tpu.memory_space<vmem>>, vector<16x384xbf16>,
    %6 = vector.extract_strided_slice %1 {offsets = [0, 2], sizes = [16, 384], strides = [1, 1]} : vector<16x432xbf16> to vector<16x384xbf16>
    %c32 = arith.constant 32 : index
    %c0_5 = arith.constant 0 : index
    %7 = vector.load %arg5[%c32, %c0_5] : memref<144x384xbf16, #tpu.memory_space<vmem>>, vector<16x384xbf16>
    tpu.vector_store %arg5[%c32, %c0_5], %6 {strides = array<i32>} : memref<144x384xbf16, #tpu.memory_space<vmem>>, vector<16x384xbf16>,
    %8 = vector.extract_strided_slice %1 {offsets = [0, 18], sizes = [16, 384], strides = [1, 1]} : vector<16x432xbf16> to vector<16x384xbf16>
    %c48 = arith.constant 48 : index
    %c0_6 = arith.constant 0 : index
    %9 = vector.load %arg5[%c48, %c0_6] : memref<144x384xbf16, #tpu.memory_space<vmem>>, vector<16x384xbf16>
    tpu.vector_store %arg5[%c48, %c0_6], %8 {strides = array<i32>} : memref<144x384xbf16, #tpu.memory_space<vmem>>, vector<16x384xbf16>,
    %10 = vector.extract_strided_slice %1 {offsets = [0, 19], sizes = [16, 384], strides = [1, 1]} : vector<16x432xbf16> to vector<16x384xbf16>
    %c64 = arith.constant 64 : index
    %c0_7 = arith.constant 0 : index
    %11 = vector.load %arg5[%c64, %c0_7] : memref<144x384xbf16, #tpu.memory_space<vmem>>, vector<16x384xbf16>
    tpu.vector_store %arg5[%c64, %c0_7], %10 {strides = array<i32>} : memref<144x384xbf16, #tpu.memory_space<vmem>>, vector<16x384xbf16>,
    %12 = vector.extract_strided_slice %1 {offsets = [0, 20], sizes = [16, 384], strides = [1, 1]} : vector<16x432xbf16> to vector<16x384xbf16>
    %c80 = arith.constant 80 : index
    %c0_8 = arith.constant 0 : index
    %13 = vector.load %arg5[%c80, %c0_8] : memref<144x384xbf16, #tpu.memory_space<vmem>>, vector<16x384xbf16>
    tpu.vector_store %arg5[%c80, %c0_8], %12 {strides = array<i32>} : memref<144x384xbf16, #tpu.memory_space<vmem>>, vector<16x384xbf16>,
    %14 = vector.extract_strided_slice %1 {offsets = [0, 36], sizes = [16, 384], strides = [1, 1]} : vector<16x432xbf16> to vector<16x384xbf16>
    %c96 = arith.constant 96 : index
    %c0_9 = arith.constant 0 : index
    %15 = vector.load %arg5[%c96, %c0_9] : memref<144x384xbf16, #tpu.memory_space<vmem>>, vector<16x384xbf16>
    tpu.vector_store %arg5[%c96, %c0_9], %14 {strides = array<i32>} : memref<144x384xbf16, #tpu.memory_space<vmem>>, vector<16x384xbf16>,
    %16 = vector.extract_strided_slice %1 {offsets = [0, 37], sizes = [16, 384], strides = [1, 1]} : vector<16x432xbf16> to vector<16x384xbf16>
    %c112 = arith.constant 112 : index
    %c0_10 = arith.constant 0 : index
    %17 = vector.load %arg5[%c112, %c0_10] : memref<144x384xbf16, #tpu.memory_space<vmem>>, vector<16x384xbf16>
    tpu.vector_store %arg5[%c112, %c0_10], %16 {strides = array<i32>} : memref<144x384xbf16, #tpu.memory_space<vmem>>, vector<16x384xbf16>,
    %18 = vector.extract_strided_slice %1 {offsets = [0, 38], sizes = [16, 384], strides = [1, 1]} : vector<16x432xbf16> to vector<16x384xbf16>
    %c128 = arith.constant 128 : index
    %c0_11 = arith.constant 0 : index
    %19 = vector.load %arg5[%c128, %c0_11] : memref<144x384xbf16, #tpu.memory_space<vmem>>, vector<16x384xbf16>
    tpu.vector_store %arg5[%c128, %c0_11], %18 {strides = array<i32>} : memref<144x384xbf16, #tpu.memory_space<vmem>>, vector<16x384xbf16>,
    %c0_12 = arith.constant 0 : index
    %c0_13 = arith.constant 0 : index
    %20 = vector.load %arg2[%c0_12, %c0_13] : memref<16x144xbf16, #tpu.memory_space<vmem>>, vector<16x144xbf16>
    %c0_14 = arith.constant 0 : index
    %c0_15 = arith.constant 0 : index
    %21 = vector.load %arg5[%c0_14, %c0_15] : memref<144x384xbf16, #tpu.memory_space<vmem>>, vector<144x384xbf16>
    %cst = arith.constant dense<0.000000e+00> : vector<16x384xf32>
    %22 = tpu.matmul %20, %21, %cst {dimension_numbers = #tpu.dot_dimension_numbers<[1], [0], [0], [1], [0, 0, 1, 1], [], []>} : vector<16x144xbf16>, vector<144x384xbf16>, vector<16x384xf32> -> vector<16x384xf32>
    %c0_16 = arith.constant 0 : index
    %c0_17 = arith.constant 0 : index
    %23 = vector.load %arg3[%c0_16, %c0_17] : memref<16x1xf32, #tpu.memory_space<vmem>>, vector<16x1xf32>
    %24 = vector.broadcast %23 : vector<16x1xf32> to vector<16x384xf32>
    %25 = arith.addf %22, %24 : vector<16x384xf32>
    %cst_18 = arith.constant 0.000000e+00 : f32
    %26 = vector.broadcast %cst_18 : f32 to vector<16x384xf32>
    %27 = arith.cmpf ogt, %25, %26 : vector<16x384xf32>
    %cst_19 = arith.constant 2.000000e-01 : f32
    %28 = vector.broadcast %cst_19 : f32 to vector<16x384xf32>
    %29 = arith.mulf %28, %25 : vector<16x384xf32>
    %30 = arith.select %27, %25, %29 : vector<16x384xi1>, vector<16x384xf32>
    %31 = arith.truncf %30 : vector<16x384xf32> to vector<16x384xbf16>
    %c0_20 = arith.constant 0 : index
    %c0_21 = arith.constant 0 : index
    %c0_22 = arith.constant 0 : index
    %32 = vector.load %arg4[%c0_20, %c0_21, %c0_22] : memref<1x16x384xbf16, #tpu.memory_space<vmem>>, vector<1x16x384xbf16>
    %33 = vector.shape_cast %32 : vector<1x16x384xbf16> to vector<16x384xbf16>
    %34 = vector.shape_cast %31 : vector<16x384xbf16> to vector<1x16x384xbf16>
    tpu.vector_store %arg4[%c0_20, %c0_21, %c0_22], %34 {strides = array<i32>} : memref<1x16x384xbf16, #tpu.memory_space<vmem>>, vector<1x16x384xbf16>,
    return
  }
  func.func @transform_0(%arg0: i32) -> (i32, i32, i32) {
    %c0_i32 = arith.constant 0 : i32
    %c0_i32_0 = arith.constant 0 : i32
    %c0_i32_1 = arith.constant 0 : i32
    return %arg0, %c0_i32, %c0_i32_0 : i32, i32, i32
  }
  func.func @transform_1(%arg0: i32) -> (i32, i32) {
    %c0_i32 = arith.constant 0 : i32
    %c0_i32_0 = arith.constant 0 : i32
    %c0_i32_1 = arith.constant 0 : i32
    return %c0_i32, %c0_i32_0 : i32, i32
  }
  func.func @transform_2(%arg0: i32) -> (i32, i32) {
    %c0_i32 = arith.constant 0 : i32
    %c0_i32_0 = arith.constant 0 : i32
    %c0_i32_1 = arith.constant 0 : i32
    return %c0_i32, %c0_i32_0 : i32, i32
  }
  func.func @transform_3(%arg0: i32) -> (i32, i32, i32) {
    %c0_i32 = arith.constant 0 : i32
    %c0_i32_0 = arith.constant 0 : i32
    %c0_i32_1 = arith.constant 0 : i32
    return %arg0, %c0_i32, %c0_i32_0 : i32, i32, i32
  }
}

</mosaic_0001>

<bundles_post_ra>
// kernel: tpu_custom_call.1
= control target key start
LH: loop header
LB: loop body
LE: loop exit
PB: predicated region body
PF: predicated region fallthrough
CT: control target
= control target key end

     0   :  { %8 = vsyncpa [#allocation4], 0  ;;  %s1418_s0 = inlined_call_operand.hbm [shape: bf16[2,16,432], index: 0, kind: input, shape index: {}]   ;;  %s1419_s1 = inlined_call_operand.vmem [shape: bf16[16,144], index: 1, kind: input, shape index: {}]   ;;  %s1420_s2 = inlined_call_operand.vmem [shape: f32[16,1], index: 2, kind: input, shape index: {}]   ;;  %s1421_s3 = inlined_call_operand.hbm [shape: bf16[2,16,384], index: 3, kind: output, shape index: {}]  }
   0x1   :  { %10 = vsyncpa [#allocation4 + $0x1], 0 }
   0x2   :  { %11 = vsyncpa [#allocation5], 0 }
   0x3   :  { %13 = vsyncpa [#allocation5 + $0x1], 0  ;;  %s1181_s12 = smov 0   ;;  %s1183_s13 = smov 0  }
   0x4   :  { %s1185_s14 = smov 0   ;;  %s1187_s15 = smov 0  }
   0x5 LB: > { %s1202_s16 = sadd.s32 4294967295, %s1146_s15   ;;  %s827_s17 = sadd.s32 4294967294, %s1146_s15   ;;  %s1146_s15 = sphi %s1187_s15, %s1431_s15   ;;  %s1142_s14 = sphi %s1185_s14, %s1430_s14   ;;  %s1138_s13 = sphi %s1183_s13, %s1429_s13   ;;  %s1134_s12 = sphi %s1181_s12, %s1428_s12  }
   0x6   : > { %s1206_s18 = sadd.s32 1, %s1146_s15   ;;  %s26_s19 = sadd.s32 1, %s1142_s14 }
   0x7   : > { %s23_s20 = ssub.s32 %s1146_s15, %s1206_s18  ;;  %p33_p0 = scmp.ne.s32.totalorder %s1142_s14, %s1138_s13 }
   0x8   : > { %p24_p1 = scmp.eq.s32.totalorder %s23_s20, 0  ;;  %p34_p2 = scmp.eq.s32.totalorder %s1146_s15, 0 }
   0x9   : > { %p39_p3 = scmp.ne.s32.totalorder %s1138_s13, %s1134_s12  ;;  %p40_p4 = scmp.eq.s32.totalorder %s1202_s16, 0 }
   0xa   : > { %s1218_s21 = scalar_select %p24_p1, %s1142_s14, %s26_s19  }
   0xb   : > { %p1220_p5 = por %p34_p2, %p33_p0  ;;  %p1224_p6 = por %p40_p4, %p39_p3 }
   0xc   : > { %p105_p7 = scmp.eq.s32.totalorder %s1202_s16, 1  ;;  %p111_p8 = scmp.eq.s32.totalorder %s827_s17, 1 }
   0xd   : > { %p1001_p10 = scmp.lt.s32.totalorder %s1146_s15, 2  ;;  %s137_s26 = sand.u32 1, %s1142_s14  }
   0xe   : > { %p1231_p11 = por %p105_p7, %p33_p0  ;;  %p1235_p12 = por %p111_p8, %p39_p3 }
   0xf   : > { %s957_s27 = sshll.u32 %s1146_s15, 5  ;;  %s830_s28 = sshll.u32 %s137_s26, 5 }
  0x10   : > { %s146_s4 = scalar_lea.hbm %s1418_s0, %s957_s27  ;;  %s141_s6 = scalar_lea.vmem [#allocation3], %s830_s28 }
  0x11   : > { %s147_s5 = sshll.u32 %s146_s4, 4  ;;  %s149_s7 = sshll.u32 %s141_s6, 4  ;;  %s148_s5 = int_to_ptr.hbm [resolvable:$true] %s147_s5  ;;  %s150_s7 = int_to_ptr.vmem [resolvable:$true] %s149_s7 }
  0x12   : > { %p1246_p13 = pnand %p1001_p10, %p1220_p5  ;;  %p833_p0 = scmp.ge.s32.totalorder %s1146_s15, 1 }
  0x13   : > { %p157_p1 = scmp.lt.s32.totalorder %s1146_s15, 3  ;;  %s138_s9 = scalar_lea.sflag [#allocation4], %s137_s26 }
  0x14   : > { %s1050_s10 = sshra.s32 %s148_s5, 4  ;;  %p1054_p3 = pneg %p1246_p13  ;;  %s1051_s10 = int_to_ptr.hbm [resolvable:$true] %s1050_s10 }
  0x15   : > { %s1052_s11 = scalar_lea.hbm %s1051_s10, 32  ;;  %s1057_s20 = scalar_lea.hbm %s1418_s0, 64 }
  0x16   : > { %p1053_p2 = scmp.ne.s32.totalorder %s1051_s10, %s1052_s11  ;;  %p1058_p5 = scmp.lt.s32.totalorder %s1051_s10, %s1418_s0 }
  0x17   : > { %p1059_p8 = scmp.lt.s32.totalorder %s1057_s20, %s1052_s11 }
  0x18   : > { %p1055_p4 = pnand %p1054_p3, %p1053_p2 }
  0x19   : > { %p1060_p10 = por %p1059_p8, %p1058_p5 }
  0x1a   : > { %p1056_p7 = pneg %p1055_p4 }
  0x1c   : > { %p1061_p9 = pnand %p1060_p10, %p1056_p7 }
  0x1e   : > { %1064 = shalt.err (!%p1061_p9)
}
  0x1f   : > { %s1148_s26 = smov 256   ;;  %s1149_s28 = smov 16  }
  0x20   : > { %996 = dma.hbm_to_vmem [thread:$0]  (!%p1246_p13), %s148_s5, 512, %s150_s7, %s138_s9, %s1148_s26, %s1148_s26, %s1149_s28  }
  0x21   : > { %p158_p2 = pnand %p833_p0, %p157_p1 }
  0x22   : > { %s1267_s29 = sand.u32 (!%p158_p2), 1, %s1138_s13  }
  0x23   : > { %161 = sbr.rel (%p158_p2) target bundleno = 411 (0x19b), region = 32  ;;  %s834_s30 = sshll.u32 (!%p158_p2), %s1267_s29, 5 }
  0x24   : > { %s164_s4 = scalar_lea.sflag (!%p158_p2), [#allocation4], %s1267_s29  ;;  %s167_s6 = scalar_lea.vmem (!%p158_p2), [#allocation3], %s834_s30 }
  0x28   : > { %1125 = dma.done.wait (%p1224_p6), %s164_s4, 512  }
  0x29   : > { %1127 = vsyncadd (%p1224_p6), %s164_s4, 4294966784  ;;  %v194_v0 = vld [vmem:[%s167_s6 + $0x10] sm:$0xff]  ;;  %v192_v1 = vld [vmem:[%s167_s6] sm:$0xff]  ;;  %s1150_s5 = smov 91   ;;  %s1151_s7 = smov 92   ;;  %vm216_vm0 = vcmask 1043456  }
  0x2a   : > { %371 = vrot.lane.b32.xlu1 %v194_v0, %s1150_s5  ;;  %198 = vst [vmem:[#allocation2 + $0xc] sm:$0xff] %v194_v0  ;;  %367 = vrot.lane.b32.xlu0 %v192_v1, %s1150_s5  ;;  %v195_v2 = vld [vmem:[%s167_s6 + $0x18] sm:$0xff]  ;;  %v193_v3 = vld [vmem:[%s167_s6 + $0x8] sm:$0xff]  ;;  %s1152_s23 = smov 108   ;;  %s1153_s8 = smov 109   ;;  %vm353_vm1 = vcmask 752640  }
  0x2b   : > { %196 = vst [vmem:[#allocation2] sm:$0xff] %v192_v1  ;;  %340 = vrot.lane.b32.xlu2 %v192_v1, %s1151_s7  ;;  %s1154_s9 = smov 90   ;;  %s1155_s10 = smov 110   ;;  %vm326_vm2 = vcmask 883712   ;;  %vm380_vm3 = vcmask 744448   ;;  %vm407_vm4 = vcmask 736256  }
  0x2c   : > { %199 = vst [vmem:[#allocation2 + $0x14] sm:$0xf] %v195_v2  ;;  %s1156_s11 = smov 126   ;;  %s1157_s17 = smov 127   ;;  %vm299_vm5 = vcmask 891904   ;;  %vm272_vm6 = vcmask 900096  }
  0x2d   : > { %197 = vst [vmem:[#allocation2 + $0x8] sm:$0xf] %v193_v3  ;;  %vm218_vm7 = vcmask 1039360   ;;  %vm624_vm8 = vcmask 130048   ;;  %vm245_vm9 = vcmask 1031168   ;;  %s739_s22 = scalar_lea.sflag [#allocation5], %s1267_s29 }
  0x2e   : > { %s1100_s4 = scalar_lea.hbm %s1421_s3, 48 }
  0x32   : > { %373 = vrot.lane.b32.xlu1 %v195_v2, %s1150_s5  ;;  %369 = vrot.lane.b32.xlu0 %v193_v3, %s1150_s5 }
  0x33   : > { %342 = vrot.lane.b32.xlu2 %v193_v3, %s1151_s7 }
  0x3a   : > { %346 = vrot.lane.b32.xlu1 %v195_v2, %s1151_s7  ;;  %344 = vrot.lane.b32.xlu0 %v194_v0, %s1151_s7 }
  0x3b   : > { %313 = vrot.lane.b32.xlu2 %v192_v1, %s1152_s23 }
  0x42   : > { %317 = vrot.lane.b32.xlu1 %v194_v0, %s1152_s23  ;;  %315 = vrot.lane.b32.xlu0 %v193_v3, %s1152_s23 }
  0x43   : > { %319 = vrot.lane.b32.xlu2 %v195_v2, %s1152_s23 }
  0x4a   : > { %288 = vrot.lane.b32.xlu1 %v193_v3, %s1153_s8  ;;  %286 = vrot.lane.b32.xlu0 %v192_v1, %s1153_s8 }
  0x4b   : > { %290 = vrot.lane.b32.xlu2 %v194_v0, %s1153_s8 }
  0x52   : > { %394 = vrot.lane.b32.xlu1 %v192_v1, %s1154_s9  ;;  %292 = vrot.lane.b32.xlu0 %v195_v2, %s1153_s8  ;;  %s987_s8 = smul.u32 24, %s1267_s29 }
  0x53   : > { %396 = vrot.lane.b32.xlu2 %v193_v3, %s1154_s9 }
  0x5a   : > { %400 = vrot.lane.b32.xlu1 %v195_v2, %s1154_s9  ;;  %398 = vrot.lane.b32.xlu0 %v194_v0, %s1154_s9  ;;  %s1378_s9 = scalar_lea.vmem [#allocation6], %s987_s8 }
  0x5b   : > { %259 = vrot.lane.b32.xlu2 %v192_v1, %s1155_s10  ;;  %s751_s20 = sshll.u32 %s1378_s9, 4  ;;  %s752_s20 = int_to_ptr.vmem [resolvable:$true] %s751_s20 }
  0x62   : > { %263 = vrot.lane.b32.xlu1 %v194_v0, %s1155_s10  ;;  %261 = vrot.lane.b32.xlu0 %v193_v3, %s1155_s10 }
  0x63   : > { %265 = vrot.lane.b32.xlu2 %v195_v2, %s1155_s10  ;;  %s988_s10 = smul.u32 24, %s1202_s16 }
  0x65   : > { %s750_s19 = scalar_lea.hbm %s1421_s3, %s988_s10 }
  0x66   : > { %s753_s16 = sshll.u32 %s750_s19, 4  ;;  %s754_s16 = int_to_ptr.hbm [resolvable:$true] %s753_s16 }
  0x67   : > { %s1094_s27 = sshra.s32 %s754_s16, 4  ;;  %s1095_s27 = int_to_ptr.hbm [resolvable:$true] %s1094_s27 }
  0x68   : > { %s1096_s26 = scalar_lea.hbm %s1095_s27, 24  ;;  %p1101_p0 = scmp.lt.s32.totalorder %s1095_s27, %s1421_s3 }
  0x69   : > { %p1097_p6 = scmp.ne.s32.totalorder %s1095_s27, %s1096_s26  ;;  %p1102_p1 = scmp.lt.s32.totalorder %s1100_s4, %s1096_s26 }
  0x6a   : > { %234 = vrot.lane.b32.xlu1 %v193_v3, %s1156_s11  ;;  %232 = vrot.lane.b32.xlu0 %v192_v1, %s1156_s11 }
  0x6b   : > { %236 = vrot.lane.b32.xlu2 %v194_v0, %s1156_s11  ;;  %p1098_p9 = pnand %p1097_p6, %p1231_p11  ;;  %p1103_p3 = por %p1102_p1, %p1101_p0 }
  0x6d   : > { %p1099_p13 = pneg %p1098_p9 }
  0x6f   : > { %p1104_p4 = pnand %p1103_p3, %p1099_p13 }
  0x72   : > { %204 = vrot.lane.b32.xlu1 %v192_v1, %s1157_s17  ;;  %238 = vrot.lane.b32.xlu0 %v195_v2, %s1156_s11 }
  0x73   : > { %206 = vrot.lane.b32.xlu2 %v193_v3, %s1157_s17 }
  0x7a   : > { %210 = vrot.lane.b32.xlu1 %v195_v2, %s1157_s17  ;;  %208 = vrot.lane.b32.xlu0 %v194_v0, %s1157_s17 }
  0x85   : > { %v341_v4 = vpop.permute.xlu2 %340 }
  0x86   : > { %v348_v5 = vrot.slane %v341_v4, 4 }
  0x8d   : > { %v343_v6 = vpop.permute.xlu2 %342 }
  0x8e   : > { %v349_v7 = vrot.slane %v343_v6, 4 }
  0x90   : > { %v352_v8 = vsel %vm216_vm0, %v348_v5, %v349_v7  ;;  %v355_v9 = vsel %vm353_vm1, %v343_v6, %v349_v7 }
  0x91   : > { %v354_v10 = vsel %vm353_vm1, %v341_v4, %v352_v8  ;;  %364 = vst [vmem:[#allocation2 + $0x98] sm:$0xf] %v355_v9 }
  0x92   : > { %363 = vst [vmem:[#allocation2 + $0x90] sm:$0xff] %v354_v10 }
  0x95   : > { %v314_v11 = vpop.permute.xlu2 %313 }
  0x96   : > { %v321_v46 = vrot.slane %v314_v11, 4 }
  0x99   : > { %v917_v55 = vld [vmem:[#allocation2 + $0x90] sm:$0xf]  ;;  %v978_v56 = vld [vmem:[#allocation2 + $0x94] sm:$0xf] }
  0x9c   : > { %v372_v12 = vpop.permute.xlu1 %371  ;;  %v368_v13 = vpop.permute.xlu0 %367 }
  0x9d   : > { %v320_v14 = vpop.permute.xlu2 %319  ;;  %v377_v19 = vrot.slane %v372_v12, 4  ;;  %v375_v20 = vrot.slane %v368_v13, 4 }
  0x9e   : > { %v324_v15 = vrot.slane %v320_v14, 4 }
  0xa0   : > { %v331_v16 = vsel %vm326_vm2, %v320_v14, %v324_v15 }
  0xa1   : > { %339 = vst [vmem:[#allocation2 + $0x8c] sm:$0xf] %v331_v16 }
  0xa4   : > { %v374_v17 = vpop.permute.xlu1 %373  ;;  %v370_v18 = vpop.permute.xlu0 %369 }
  0xa5   : > { %v378_v21 = vrot.slane %v374_v17, 4  ;;  %v376_v22 = vrot.slane %v370_v18, 4  ;;  %v1279_v23 = vpop.permute.xlu2 %290 }
  0xa7   : > { %v383_v24 = vsel %vm216_vm0, %v377_v19, %v378_v21  ;;  %v385_v25 = vsel %vm380_vm3, %v374_v17, %v378_v21  ;;  %v379_v26 = vsel %vm216_vm0, %v375_v20, %v376_v22  ;;  %v382_v29 = vsel %vm380_vm3, %v370_v18, %v376_v22 }
  0xa8   : > { %v384_v27 = vsel %vm380_vm3, %v372_v12, %v383_v24  ;;  %393 = vst [vmem:[#allocation2 + $0xbc] sm:$0xf] %v385_v25  ;;  %v381_v28 = vsel %vm380_vm3, %v368_v13, %v379_v26 }
  0xa9   : > { %392 = vst [vmem:[#allocation2 + $0xb4] sm:$0xff] %v384_v27 }
  0xaa   : > { %390 = vst [vmem:[#allocation2 + $0xa8] sm:$0xff] %v381_v28 }
  0xab   : > { %391 = vst [vmem:[#allocation2 + $0xb0] sm:$0xf] %v382_v29 }
  0xac   : > { %v347_v30 = vpop.permute.xlu1 %346  ;;  %v345_v31 = vpop.permute.xlu0 %344 }
  0xad   : > { %v351_v32 = vrot.slane %v347_v30, 4  ;;  %v350_v33 = vrot.slane %v345_v31, 4  ;;  %v1283_v34 = vpop.permute.xlu2 %396 }
  0xae   : > { %v403_v35 = vrot.slane %v1283_v34, 4 }
  0xaf   : > { %v358_v36 = vsel %vm353_vm1, %v347_v30, %v351_v32  ;;  %v356_v37 = vsel %vm216_vm0, %v350_v33, %v351_v32 }
  0xb0   : > { %366 = vst [vmem:[#allocation2 + $0xa4] sm:$0xf] %v358_v36  ;;  %v357_v38 = vsel %vm353_vm1, %v345_v31, %v356_v37  ;;  %v982_v39 = vld [vmem:[#allocation2 + $0xb0] sm:$0xf0]  ;;  %v931_v40 = vld [vmem:[#allocation2 + $0xb4] sm:$0xf0]  ;;  %v409_v41 = vsel %vm407_vm4, %v1283_v34, %v403_v35 }
  0xb1   : > { %365 = vst [vmem:[#allocation2 + $0x9c] sm:$0xff] %v357_v38  ;;  %v929_v42 = vld [vmem:[#allocation2 + $0xa8] sm:$0xf]  ;;  %v981_v43 = vld [vmem:[#allocation2 + $0xac] sm:$0xf] }
  0xb2   : > { %v930_v44 = vor.u32 %v982_v39, %v929_v42  ;;  %v934_v45 = vor.u32 %v981_v43, %v931_v40  ;;  %418 = vst [vmem:[#allocation2 + $0xc8] sm:$0xf] %v409_v41 }
  0xb4   : > { %628 = vmatpush.bf16.msra.mxu0 %v930_v44  ;;  %656 = vmatpush.bf16.msra.mxu2 %v934_v45  ;;  %v318_v47 = vpop.permute.xlu1 %317  ;;  %v316_v48 = vpop.permute.xlu0 %315 }
  0xb5   : > { %v323_v49 = vrot.slane %v318_v47, 4  ;;  %v322_v50 = vrot.slane %v316_v48, 4  ;;  %v1293_v51 = vpop.permute.xlu2 %259 }
  0xb6   : > { %v267_v42 = vrot.slane %v1293_v51, 4 }
  0xb7   : > { %v329_v52 = vsel %vm216_vm0, %v323_v49, %v324_v15  ;;  %v325_v53 = vsel %vm216_vm0, %v321_v46, %v322_v50  ;;  %v328_v54 = vsel %vm326_vm2, %v316_v48, %v322_v50  ;;  %v296_v15 = vrot.slane %v1279_v23, 4  ;;  %v937_v48 = vld [vmem:[#allocation2 + $0xb0] sm:$0xf]  ;;  %v958_v49 = vld [vmem:[%s1419_s1 + $0x4] sm:$0xf] }
  0xb8   : > { %v330_v57 = vsel %vm326_vm2, %v318_v47, %v329_v52  ;;  %v327_v58 = vsel %vm326_vm2, %v314_v11, %v325_v53  ;;  %337 = vst [vmem:[#allocation2 + $0x80] sm:$0xf] %v328_v54  ;;  %v979_v59 = vld [vmem:[#allocation2 + $0x98] sm:$0xf0]  ;;  %v919_v60 = vld [vmem:[#allocation2 + $0x9c] sm:$0xf0] }
  0xb9   : > { %338 = vst [vmem:[#allocation2 + $0x84] sm:$0xff] %v330_v57  ;;  %v918_v61 = vor.u32 %v979_v59, %v917_v55  ;;  %v922_v62 = vor.u32 %v978_v56, %v919_v60  ;;  %v983_v47 = vld [vmem:[#allocation2 + $0xb8] sm:$0xf0]  ;;  %v839_v50 = vld [vmem:[%s1419_s1 + $0x8] sm:$0xf0] }
  0xba   : > { %336 = vst [vmem:[#allocation2 + $0x78] sm:$0xff] %v327_v58 }
  0xbb   : > { %629 = vmatpush.bf16.msra.mxu0 %v918_v61  ;;  %657 = vmatpush.bf16.msra.mxu2 %v922_v62 }
  0xbc   : > { %v289_v63 = vpop.permute.xlu1 %288  ;;  %v287_v0 = vpop.permute.xlu0 %286 }
  0xbd   : > { %v295_v1 = vrot.slane %v289_v63, 4  ;;  %v294_v2 = vrot.slane %v287_v0, 4  ;;  %v1300_v3 = vpop.permute.xlu2 %265 }
  0xbe   : > { %v270_v4 = vrot.slane %v1300_v3, 4 }
  0xbf   : > { %v301_v5 = vsel %vm299_vm5, %v289_v63, %v295_v1  ;;  %v298_v6 = vsel %vm216_vm0, %v294_v2, %v295_v1  ;;  %v938_v1 = vor.u32 %v983_v47, %v937_v48 }
  0xc0   : > { %310 = vst [vmem:[#allocation2 + $0x68] sm:$0xf] %v301_v5  ;;  %v300_v7 = vsel %vm299_vm5, %v287_v0, %v298_v6  ;;  %v976_v8 = vld [vmem:[#allocation2 + $0x80] sm:$0xf0]  ;;  %v907_v9 = vld [vmem:[#allocation2 + $0x84] sm:$0xf0]  ;;  %v277_v10 = vsel %vm272_vm6, %v1300_v3, %v270_v4  ;;  %v1342_v3 = vor.u32 %v958_v49, %v839_v50 }
  0xc1   : > { %309 = vst [vmem:[#allocation2 + $0x60] sm:$0xff] %v300_v7  ;;  %v905_v11 = vld [vmem:[#allocation2 + $0x78] sm:$0xf]  ;;  %v975_v12 = vld [vmem:[#allocation2 + $0x7c] sm:$0xf] }
  0xc2   : > { %v906_v13 = vor.u32 %v976_v8, %v905_v11  ;;  %v910_v14 = vor.u32 %v975_v12, %v907_v9  ;;  %285 = vst [vmem:[#allocation2 + $0x5c] sm:$0xf] %v277_v10  ;;  %v949_v0 = vld [vmem:[#allocation2 + $0xc8] sm:$0xf]  ;;  %v925_v8 = vld [vmem:[#allocation2 + $0x98] sm:$0xf] }
  0xc3   : > { %v913_v12 = vld [vmem:[#allocation2 + $0x80] sm:$0xf] }
  0xc4   : > { %630 = vmatpush.bf16.msra.mxu0 %v906_v13  ;;  %658 = vmatpush.bf16.msra.mxu2 %v910_v14  ;;  %v395_v16 = vpop.permute.xlu1 %394  ;;  %v293_v17 = vpop.permute.xlu0 %292  ;;  %v977_v13 = vld [vmem:[#allocation2 + $0x88] sm:$0xf0] }
  0xc5   : > { %v402_v18 = vrot.slane %v395_v16, 4  ;;  %v297_v19 = vrot.slane %v293_v17, 4  ;;  %v1309_v20 = vpop.permute.xlu2 %236 }
  0xc7   : > { %v406_v21 = vsel %vm216_vm0, %v402_v18, %v403_v35  ;;  %v302_v22 = vsel %vm216_vm0, %v296_v15, %v297_v19  ;;  %v304_v24 = vsel %vm299_vm5, %v293_v17, %v297_v19 }
  0xc8   : > { %v408_v25 = vsel %vm407_vm4, %v395_v16, %v406_v21  ;;  %v303_v26 = vsel %vm299_vm5, %v1279_v23, %v302_v22  ;;  %312 = vst [vmem:[#allocation2 + $0x74] sm:$0xf] %v304_v24  ;;  %v893_v23 = vld [vmem:[#allocation2 + $0x60] sm:$0xf]  ;;  %v972_v36 = vld [vmem:[#allocation2 + $0x64] sm:$0xf] }
  0xc9   : > { %417 = vst [vmem:[#allocation2 + $0xc0] sm:$0xff] %v408_v25  ;;  %v460_v22 = vld [vmem:[%s1420_s2 + $0x8] sm:$0xff]  ;;  %v242_v24 = vrot.slane %v1309_v20, 4  ;;  %v914_v25 = vor.u32 %v977_v13, %v913_v12 }
  0xca   : > { %311 = vst [vmem:[#allocation2 + $0x6c] sm:$0xff] %v303_v26  ;;  %v1158_v26 = vmov 0  }
  0xcb   : > { %1049 = vset.pattern.permute.xlu0 %v1158_v26  ;;  %1048 = vset.pattern.permute.xlu2 %v1158_v26 }
  0xcc   : > { %v401_v27 = vpop.permute.xlu1 %400  ;;  %v399_v28 = vpop.permute.xlu0 %398  ;;  %468 = vperm.xlu0 %1049, %v460_v22  }
  0xcd   : > { %v405_v29 = vrot.slane %v401_v27, 4  ;;  %v404_v30 = vrot.slane %v399_v28, 4  ;;  %v1319_v31 = vpop.permute.xlu2 %206 }
  0xce   : > { %v213_v32 = vrot.slane %v1319_v31, 4 }
  0xcf   : > { %v412_v33 = vsel %vm407_vm4, %v401_v27, %v405_v29  ;;  %v410_v34 = vsel %vm216_vm0, %v404_v30, %v405_v29  ;;  %v459_v27 = vld [vmem:[%s1420_s2] sm:$0xff]  ;;  %v974_v30 = vld [vmem:[#allocation2 + $0x70] sm:$0xf0] }
  0xd0   : > { %420 = vst [vmem:[#allocation2 + $0xd4] sm:$0xf] %v412_v33  ;;  %v411_v35 = vsel %vm407_vm4, %v399_v28, %v410_v34  ;;  %v220_v37 = vsel %vm218_vm7, %v1319_v31, %v213_v32  ;;  %v941_v55 = vld [vmem:[#allocation2 + $0xc0] sm:$0xf]  ;;  %v984_v56 = vld [vmem:[#allocation2 + $0xc4] sm:$0xf]  ;;  %463 = vperm.xlu2 %1048, %v459_v27  }
  0xd1   : > { %419 = vst [vmem:[#allocation2 + $0xcc] sm:$0xff] %v411_v35  ;;  %v973_v38 = vld [vmem:[#allocation2 + $0x68] sm:$0xf0]  ;;  %v895_v39 = vld [vmem:[#allocation2 + $0x6c] sm:$0xf0] }
  0xd2   : > { %v894_v40 = vor.u32 %v973_v38, %v893_v23  ;;  %v898_v41 = vor.u32 %v972_v36, %v895_v39  ;;  %229 = vst [vmem:[#allocation2 + $0x20] sm:$0xf] %v220_v37  ;;  %v901_v35 = vld [vmem:[#allocation2 + $0x68] sm:$0xf] }
  0xd3   : > { %v902_v38 = vor.u32 %v974_v30, %v901_v35 }
  0xd4   : > { %631 = vmatpush.bf16.msra.mxu0 %v894_v40  ;;  %659 = vmatpush.bf16.msra.mxu2 %v898_v41  ;;  %v264_v43 = vpop.permute.xlu1 %263  ;;  %v262_v44 = vpop.permute.xlu0 %261 }
  0xd5   : > { %v269_v45 = vrot.slane %v264_v43, 4  ;;  %v268_v46 = vrot.slane %v262_v44, 4 }
  0xd7   : > { %v275_v52 = vsel %vm216_vm0, %v269_v45, %v270_v4  ;;  %v271_v53 = vsel %vm216_vm0, %v267_v42, %v268_v46  ;;  %v274_v54 = vsel %vm272_vm6, %v262_v44, %v268_v46  ;;  %v986_v57 = vld [vmem:[#allocation2 + $0xd0] sm:$0xf0]  ;;  %v980_v4 = vld [vmem:[#allocation2 + $0xa0] sm:$0xf0]  ;;  %v971_v42 = vld [vmem:[#allocation2 + $0x58] sm:$0xf0] }
  0xd8   : > { %v276_v58 = vsel %vm272_vm6, %v264_v43, %v275_v52  ;;  %v273_v59 = vsel %vm272_vm6, %v1293_v51, %v271_v53  ;;  %283 = vst [vmem:[#allocation2 + $0x50] sm:$0xf] %v274_v54  ;;  %v985_v60 = vld [vmem:[#allocation2 + $0xc8] sm:$0xf0]  ;;  %v943_v61 = vld [vmem:[#allocation2 + $0xcc] sm:$0xf0]  ;;  %v950_v2 = vor.u32 %v986_v57, %v949_v0  ;;  %v926_v9 = vor.u32 %v980_v4, %v925_v8 }
  0xd9   : > { %284 = vst [vmem:[#allocation2 + $0x54] sm:$0xff] %v276_v58  ;;  %v942_v62 = vor.u32 %v985_v60, %v941_v55  ;;  %v946_v63 = vor.u32 %v984_v56, %v943_v61  ;;  %v865_v58 = vld [vmem:[#allocation2 + $0x20] sm:$0xf]  ;;  %v962_v60 = vld [vmem:[#allocation2 + $0x10] sm:$0xf0] }
  0xda   : > { %282 = vst [vmem:[#allocation2 + $0x48] sm:$0xff] %v273_v59  ;;  %v853_v59 = vld [vmem:[#allocation2 + $0x8] sm:$0xf]  ;;  %v845_v61 = vld [vmem:[#allocation2] sm:$0xf] }
  0xdb   : > { %649 = vmatpush.bf16.msra.mxu1 %v942_v62  ;;  %677 = vmatpush.bf16.msra.mxu3 %v946_v63  ;;  %v961_v62 = vld [vmem:[#allocation2 + $0x8] sm:$0xf0]  ;;  %v960_v63 = vld [vmem:[#allocation2 + $0x4] sm:$0xf]  ;;  %v854_v8 = vor.u32 %v962_v60, %v853_v59 }
  0xdc   : > { %v235_v5 = vpop.permute.xlu1 %234  ;;  %v233_v51 = vpop.permute.xlu0 %232 }
  0xdd   : > { %v241_v6 = vrot.slane %v235_v5, 4  ;;  %v240_v7 = vrot.slane %v233_v51, 4 }
  0xde   : > { %952 = vmatmul.msk.bf16.vlgmr.msra.gmra.mxu3 %vm624_vm8, %v1342_v3  ;;  %951 = vmatmul.msk.bf16.vlgmr.msra.gmra.mxu1 %vm624_vm8, %v1342_v3 }
  0xdf   : > { %684 = vmatpush.bf16.msrb.mxu1 %v938_v1  ;;  %705 = vmatpush.bf16.msrb.mxu3 %v950_v2  ;;  %v247_v10 = vsel %vm245_vm9, %v235_v5, %v241_v6  ;;  %v244_v11 = vsel %vm216_vm0, %v240_v7, %v241_v6  ;;  %v889_v41 = vld [vmem:[#allocation2 + $0x50] sm:$0xf] }
  0xe0   : > { %256 = vst [vmem:[#allocation2 + $0x38] sm:$0xf] %v247_v10  ;;  %v246_v14 = vsel %vm245_vm9, %v233_v51, %v244_v11  ;;  %v970_v15 = vld [vmem:[#allocation2 + $0x50] sm:$0xf0]  ;;  %v883_v16 = vld [vmem:[#allocation2 + $0x54] sm:$0xf0]  ;;  %v890_v43 = vor.u32 %v971_v42, %v889_v41  ;;  %v846_v11 = vor.u32 %v961_v62, %v845_v61 }
  0xe1   : > { %255 = vst [vmem:[#allocation2 + $0x30] sm:$0xff] %v246_v14  ;;  %v881_v17 = vld [vmem:[#allocation2 + $0x48] sm:$0xf]  ;;  %v969_v18 = vld [vmem:[#allocation2 + $0x4c] sm:$0xf] }
  0xe2   : > { %v882_v19 = vor.u32 %v970_v15, %v881_v17  ;;  %v886_v21 = vor.u32 %v969_v18, %v883_v16  ;;  %v847_v2 = vld [vmem:[#allocation2 + $0xc] sm:$0xf0]  ;;  %v959_v10 = vld [vmem:[%s1419_s1 + $0x4] sm:$0xf0] }
  0xe3   : > { %685 = vmatpush.bf16.msrb.mxu1 %v926_v9  ;;  %v837_v9 = vld [vmem:[%s1419_s1] sm:$0xf]  ;;  %v850_v12 = vor.u32 %v960_v63, %v847_v2 }
  0xe4   : > { %632 = vmatpush.bf16.msra.mxu0 %v882_v19  ;;  %660 = vmatpush.bf16.msra.mxu2 %v886_v21  ;;  %v205_v28 = vpop.permute.xlu1 %204  ;;  %v239_v29 = vpop.permute.xlu0 %238  ;;  %v838_v13 = vor.u32 %v959_v10, %v837_v9 }
  0xe5   : > { %v212_v33 = vrot.slane %v205_v28, 4  ;;  %v243_v34 = vrot.slane %v239_v29, 4 }
  0xe7   : > { %686 = vmatpush.bf16.msrb.mxu1 %v914_v25  ;;  %v217_v23 = vsel %vm216_vm0, %v212_v33, %v213_v32  ;;  %v248_v36 = vsel %vm216_vm0, %v242_v24, %v243_v34  ;;  %v250_v37 = vsel %vm245_vm9, %v239_v29, %v243_v34 }
  0xe8   : > { %v219_v39 = vsel %vm218_vm7, %v205_v28, %v217_v23  ;;  %v249_v40 = vsel %vm245_vm9, %v1309_v20, %v248_v36  ;;  %258 = vst [vmem:[#allocation2 + $0x44] sm:$0xf] %v250_v37  ;;  %v877_v20 = vld [vmem:[#allocation2 + $0x38] sm:$0xf]  ;;  %v869_v52 = vld [vmem:[#allocation2 + $0x30] sm:$0xf] }
  0xe9   : > { %228 = vst [vmem:[#allocation2 + $0x18] sm:$0xff] %v219_v39  ;;  %v966_v53 = vld [vmem:[#allocation2 + $0x34] sm:$0xf] }
  0xea   : > { %257 = vst [vmem:[#allocation2 + $0x3c] sm:$0xff] %v249_v40 }
  0xeb   : > { %687 = vmatpush.bf16.msrb.mxu1 %v902_v38 }
  0xec   : > { %v211_v31 = vpop.permute.xlu1 %210  ;;  %v209_v44 = vpop.permute.xlu0 %208 }
  0xed   : > { %v215_v32 = vrot.slane %v211_v31, 4  ;;  %v214_v45 = vrot.slane %v209_v44, 4 }
  0xee   : > { %953 = vmatmul.msk.bf16.vlgmr.msrb.gmra.mxu3 %vm624_vm8, %v1342_v3 }
  0xef   : > { %688 = vmatpush.bf16.msrb.mxu1 %v890_v43  ;;  %v223_v46 = vsel %vm218_vm7, %v211_v31, %v215_v32  ;;  %v221_v47 = vsel %vm216_vm0, %v214_v45, %v215_v32  ;;  %v968_v48 = vld [vmem:[#allocation2 + $0x40] sm:$0xf0] }
  0xf0   : > { %231 = vst [vmem:[#allocation2 + $0x2c] sm:$0xf] %v223_v46  ;;  %v222_v49 = vsel %vm218_vm7, %v209_v44, %v221_v47  ;;  %v878_v50 = vor.u32 %v968_v48, %v877_v20  ;;  %v857_v1 = vld [vmem:[#allocation2 + $0x18] sm:$0xf]  ;;  %v963_v5 = vld [vmem:[#allocation2 + $0x1c] sm:$0xf] }
  0xf1   : > { %230 = vst [vmem:[#allocation2 + $0x24] sm:$0xff] %v222_v49  ;;  %v967_v54 = vld [vmem:[#allocation2 + $0x38] sm:$0xf0]  ;;  %v871_v55 = vld [vmem:[#allocation2 + $0x3c] sm:$0xf0] }
  0xf2   : > { %v870_v56 = vor.u32 %v967_v54, %v869_v52  ;;  %v874_v57 = vor.u32 %v966_v53, %v871_v55 }
  0xf3   : > { %689 = vmatpush.bf16.msrb.mxu1 %v878_v50 }
  0xf4   : > { %633 = vmatpush.bf16.msra.mxu0 %v870_v56  ;;  %661 = vmatpush.bf16.msra.mxu2 %v874_v57 }
  0xf7   : > { %v965_v0 = vld [vmem:[#allocation2 + $0x28] sm:$0xf0] }
  0xf8   : > { %v866_v3 = vor.u32 %v965_v0, %v865_v58  ;;  %v964_v4 = vld [vmem:[#allocation2 + $0x20] sm:$0xf0]  ;;  %v859_v51 = vld [vmem:[#allocation2 + $0x24] sm:$0xf0] }
  0xf9   : > { %v858_v6 = vor.u32 %v964_v4, %v857_v1  ;;  %v862_v7 = vor.u32 %v963_v5, %v859_v51 }
  0xfa   : > { %690 = vmatpush.bf16.msrb.mxu1 %v866_v3 }
  0xfb   : > { %634 = vmatpush.bf16.msra.mxu0 %v858_v6  ;;  %662 = vmatpush.bf16.msra.mxu2 %v862_v7 }
  0xfe   : > { %691 = vmatpush.bf16.msrb.mxu1 %v854_v8 }
  0xff   : > { %635 = vmatpush.bf16.msra.mxu0 %v846_v11  ;;  %663 = vmatpush.bf16.msra.mxu2 %v850_v12 }
 0x101   : > { %692 = vmatmul.bf16.vlgmr.msrb.gmra.mxu1 %v838_v13 }
 0x102   : > { %636 = vmatmul.bf16.vlgmr.msra.gmra.mxu0 %v838_v13  ;;  %664 = vmatmul.bf16.vlgmr.msra.gmra.mxu2 %v838_v13 }
 0x12a   : > { %v464_v19 = vpop.permute.xlu2 %463 }
 0x13e   : > { %v469_v29 = vpop.permute.xlu0 %468 }
 0x15b   : > { %v651_v15 = vpop.f32.mrf.mxu1 }
 0x161   : > { %v679_v14 = vpop.f32.mrf.mxu3 }
 0x163   : > { %v653_v17 = vpop.f32.mrf.mxu1 }
 0x169   : > { %v681_v16 = vpop.f32.mrf.mxu3 }
 0x171   : > { %v707_v18 = vpop.f32.mrf.mxu3 }
 0x179   : > { %v709_v36 = vpop.f32.mrf.mxu3 }
 0x17e   : > { %v693_v21 = vpop.f32.mrf.mxu1 }
 0x17f   : > { %v694_v22 = vadd.f32 %v693_v21, %v464_v19  ;;  %v637_v24 = vpop.f32.mrf.mxu0 }
 0x180   : > { %v638_v25 = vadd.f32 %v637_v24, %v464_v19 }
 0x181   : > { %v708_v26 = vadd.f32 %v707_v18, %v694_v22 }
 0x182   : > { %v652_v28 = vadd.f32 %v651_v15, %v638_v25 }
 0x183   : > { %vm714_vm10 = vcmp.gt.f32.partialorder %v708_v26, 0.0  ;;  %v720_v27 = vmul.f32 0.2, %v708_v26 }
 0x184   : > { %v718_v39 = vmul.f32 0.2, %v652_v28  ;;  %vm712_vm11 = vcmp.gt.f32.partialorder %v652_v28, 0.0 }
 0x185   : > { %v726_v30 = vsel %vm714_vm10, %v708_v26, %v720_v27  ;;  %v665_v33 = vpop.f32.mrf.mxu2 }
 0x186   : > { %v731_v34 = vpack.c.bf16 %v726_v30, %v726_v30  ;;  %v666_v35 = vadd.f32 %v665_v33, %v464_v19  ;;  %v695_v23 = vpop.f32.mrf.mxu1  ;;  %v724_v44 = vsel %vm712_vm11, %v652_v28, %v718_v39 }
 0x187   : > { %v696_v37 = vadd.f32 %v695_v23, %v469_v29  ;;  %v639_v38 = vpop.f32.mrf.mxu0 }
 0x188   : > { %735 = vst [vmem:[%s1378_s9 + $0x8] sm:$0xf] %v731_v34  ;;  %v680_v40 = vadd.f32 %v679_v14, %v666_v35  ;;  %v640_v41 = vadd.f32 %v639_v38, %v469_v29 }
 0x189   : > { %v710_v42 = vadd.f32 %v709_v36, %v696_v37 }
 0x18a   : > { %vm713_vm12 = vcmp.gt.f32.partialorder %v680_v40, 0.0  ;;  %v719_v43 = vmul.f32 0.2, %v680_v40  ;;  %v654_v45 = vadd.f32 %v653_v17, %v640_v41 }
 0x18b   : > { %vm717_vm13 = vcmp.gt.f32.partialorder %v710_v42, 0.0  ;;  %v723_v31 = vmul.f32 0.2, %v710_v42 }
 0x18c   : > { %v725_v32 = vsel %vm713_vm12, %v680_v40, %v719_v43  ;;  %v721_v50 = vmul.f32 0.2, %v654_v45  ;;  %vm715_vm14 = vcmp.gt.f32.partialorder %v654_v45, 0.0 }
 0x18d   : > { %v730_v46 = vpack.c.bf16 %v725_v32, %v724_v44  ;;  %v729_v47 = vsel %vm717_vm13, %v710_v42, %v723_v31  ;;  %v667_v20 = vpop.f32.mrf.mxu2 }
 0x18e   : > { %v733_v48 = vpack.c.bf16 %v729_v47, %v729_v47  ;;  %v668_v49 = vadd.f32 %v667_v20, %v469_v29  ;;  %v727_v54 = vsel %vm715_vm14, %v654_v45, %v721_v50 }
 0x18f   : > { %734 = vst [vmem:[%s1378_s9] sm:$0xff] %v730_v46 }
 0x190   : > { %737 = vst [vmem:[%s1378_s9 + $0x14] sm:$0xf] %v733_v48  ;;  %v682_v52 = vadd.f32 %v681_v16, %v668_v49 }
 0x192   : > { %vm716_vm15 = vcmp.gt.f32.partialorder %v682_v52, 0.0  ;;  %v722_v53 = vmul.f32 0.2, %v682_v52 }
 0x194   : > { %v728_v55 = vsel %vm716_vm15, %v682_v52, %v722_v53 }
 0x195   : > { %v732_v56 = vpack.c.bf16 %v728_v55, %v727_v54 }
 0x197   : > { %736 = vst [vmem:[%s1378_s9 + $0xc] sm:$0xff] %v732_v56 }
 0x198   : > { %1107 = shalt.err (!%p1104_p4)
}
 0x199   : > { %s1159_s29 = smov 192   ;;  %s1160_s7 = smov 12  }
 0x19a   : > { %991 = dma.vmem_to_hbm [thread:$0]  (%p1231_p11), %s752_s20, 384, %s754_s16, %s739_s22, %s1159_s29, %s1159_s29, %s1160_s7  }
 0x19b PF: > { %s768_s23 = sand.u32 1, %s1134_s12   ;;  %p1427_p7 = scmp.ge.s32.totalorder %s1146_s15, 2 }
 0x19c   : > { %s769_s8 = scalar_lea.sflag [#allocation5], %s768_s23 }
 0x19d   : > { %p998_p5 = pnand %p1427_p7, %p1235_p12 }
 0x19f   : > { %p999_p8 = pneg %p998_p5 }
 0x1a1   : > { %1129 = dma.done.wait (%p999_p8), %s769_s8, 384  }
 0x1a2   : > { %1131 = vsyncadd (%p999_p8), %s769_s8, 4294966912  ;;  %p16_p10 = scmp.ge.s32.totalorder %s1206_s18, 4   ;;  %s1428_s12 = smov %s1138_s13 }
 0x1a3   : > { %s1429_s13 = smov %s1142_s14  ;;  %s1430_s14 = smov %s1218_s21 }
 0x1a4   : > { %s1431_s15 = smov %s1206_s18  ;;  %18 = sbr.rel (!%p16_p10) target bundleno = 5 (0x5), region = 77 }
 0x1a9   :  { %775 = vsyncpa [#allocation4], 1 }
 0x1aa   :  { %777 = vsyncpa [#allocation4 + $0x1], 1 }
 0x1ab   :  { %778 = vsyncpa [#allocation5], 1 }
 0x1ac   :  { %780 = vsyncpa [#allocation5 + $0x1], 1 }

</bundles_post_ra>
